<compile_context>
chip_gen: v7x
topology: tpu7x:2x2x1
jax: 0.10.0
libtpu: 0.0.40
codegen_flags: <defaults>
</compile_context>

<pallas_src>
import math

import numpy as np
import jax
import jax.numpy as jnp
from jax.experimental import pallas as pl
from jax.experimental.pallas import tpu as pltpu

# ------------------------------- configuration -------------------------------
BATCH = 2
IN_CHANNELS = 8
HIDDEN_CHANNELS = 16
SKIP_CHANNELS = HIDDEN_CHANNELS  # skip_channels=None -> hidden_channels
NUM_LAYERS = 4
KERNEL_SIZE = 3
DILATED = True
IS_CAUSAL = True                 # causal left-padding (kernel_size - 1) * dilation
NUM_FRAMES = 128                 # one full lane width per batch row


# --------------------------------- the kernel --------------------------------
def stacked_residual_kernel(x_ref, wconv_ref, bconv_ref, wheads_ref, bheads_ref,
                            out_ref, skip_ref):
    """Processes one batch element; NCW block with time on the lane axis.

    x_ref      : (1, Cin, T)        f32
    wconv_ref  : (L, 2H, K*Cin)     bf16  fused dilated-conv taps
    bconv_ref  : (L, 2H, 1)         f32
    wheads_ref : (L, Cskip+Cin, H)  bf16  fused 1x1 skip+out heads
    bheads_ref : (L, Cskip+Cin, 1)  f32
    out_ref    : (1, Cin, T)
    skip_ref   : (1, Cskip, T)
    """
    L, C2, KCin = wconv_ref.shape
    H = C2 // 2
    Cin = x_ref.shape[1]
    K = KCin // Cin
    T = x_ref.shape[-1]           # derived from shapes (not a baked-in constant)
    Cskip = skip_ref.shape[1]

    x = x_ref[0].astype(jnp.float32)                      # (Cin, T), residual state
    skip_acc = jnp.zeros((Cskip, T), jnp.float32)

    # lane index == time index within this batch element; causal masks reused per shift
    t_idx = jax.lax.broadcasted_iota(jnp.int32, (Cin, T), 1)
    masks = {}

    for layer in range(L):
        dilation = 2 ** layer if DILATED else 1

        # build the K shifted / causally-masked taps, fuse into one (K*Cin, T) operand
        taps = []
        for k in range(K):
            shift = (K - 1 - k) * dilation      # tap k multiplies x[:, t - shift]
            if shift == 0:
                taps.append(x)
            elif shift >= T:
                taps.append(jnp.zeros_like(x))  # tap entirely out of range
            else:
                if shift not in masks:
                    masks[shift] = t_idx >= shift
                xs = pltpu.roll(x, shift, axis=1)          # xs[:, t] = x[:, t - shift]
                taps.append(jnp.where(masks[shift], xs, 0.0))
        x_taps = jnp.concatenate(taps, axis=0).astype(jnp.bfloat16)   # (K*Cin, T)

        # gated dilated causal conv: single MXU push per layer, bias added once
        h = jnp.dot(wconv_ref[layer], x_taps,
                    preferred_element_type=jnp.float32) + bconv_ref[layer]   # (2H, T)
        z = jnp.tanh(h[:H]) * jax.nn.sigmoid(h[H:])                          # (H, T) f32

        # fused 1x1 skip + output heads: single MXU push per layer
        y = jnp.dot(wheads_ref[layer], z.astype(jnp.bfloat16),
                    preferred_element_type=jnp.float32) + bheads_ref[layer]  # (Cskip+Cin, T)
        skip_acc = skip_acc + y[:Cskip]
        x = x + y[Cskip:]

    out_ref[0] = x.astype(out_ref.dtype)          # (Cin, T)   lane-dense store
    skip_ref[0] = skip_acc.astype(skip_ref.dtype)  # (Cskip, T) lane-dense store


# --------------------------------- wrapper ------------------------------------
def _whole_array_spec(arr):
    n = arr.ndim
    return pl.BlockSpec(arr.shape, lambda b, n=n: (0,) * n)


def pack_params(params):
    """One-time repack of PyTorch-layout params into the fused kernel layout."""
    L = NUM_LAYERS
    K = KERNEL_SIZE
    Cin = IN_CHANNELS
    H = HIDDEN_CHANNELS
    # (L, 2H, Cin, K) -> (L, 2H, K, Cin) -> (L, 2H, K*Cin) so tap k pairs with x[t-(K-1-k)*d]
    wconv_fused = jnp.transpose(params["wconv"], (0, 1, 3, 2)).reshape(L, 2 * H, K * Cin)
    wheads = jnp.concatenate([params["wskip"], params["wout"]], axis=1)   # (L, Cskip+Cin, H)
    bheads = jnp.concatenate([params["bskip"], params["bout"]], axis=1)   # (L, Cskip+Cin)
    return dict(
        wconv=wconv_fused.astype(jnp.bfloat16),
        bconv=params["bconv"][:, :, None].astype(jnp.float32),
        wheads=wheads.astype(jnp.bfloat16),
        bheads=bheads[:, :, None].astype(jnp.float32),
    )


def stacked_residual_conv_block1d(x_bct, kparams):
    """x_bct: (batch, in_channels, num_frames), NCW like the PyTorch module."""
    B, Cin, T = x_bct.shape
    Cskip = kparams["wheads"].shape[1] - Cin

    out, skip = pl.pallas_call(
        stacked_residual_kernel,
        out_shape=(jax.ShapeDtypeStruct((B, Cin, T), x_bct.dtype),
                   jax.ShapeDtypeStruct((B, Cskip, T), x_bct.dtype)),
        grid=(B,),
        in_specs=[pl.BlockSpec((1, Cin, T), lambda b: (b, 0, 0)),
                  _whole_array_spec(kparams["wconv"]),
                  _whole_array_spec(kparams["bconv"]),
                  _whole_array_spec(kparams["wheads"]),
                  _whole_array_spec(kparams["bheads"])],
        out_specs=(pl.BlockSpec((1, Cin, T), lambda b: (b, 0, 0)),
                   pl.BlockSpec((1, Cskip, T), lambda b: (b, 0, 0))),
        compiler_params=pltpu.CompilerParams(dimension_semantics=("parallel",)),
    )(x_bct, kparams["wconv"], kparams["bconv"], kparams["wheads"], kparams["bheads"])
    return out, skip


# ------------------------- deterministic parameter init ------------------------
def init_params(key):
    """PyTorch-layout parameters, uniform(-1/sqrt(fan_in), 1/sqrt(fan_in)) like nn.Conv1d."""
    layer_keys = jax.random.split(key, NUM_LAYERS)
    wconv, bconv, wskip, bskip, wout, bout = [], [], [], [], [], []
    for layer in range(NUM_LAYERS):
        k1, k2, k3, k4, k5, k6 = jax.random.split(layer_keys[layer], 6)
        b_conv = 1.0 / math.sqrt(IN_CHANNELS * KERNEL_SIZE)
        b_1x1 = 1.0 / math.sqrt(HIDDEN_CHANNELS)
        wconv.append(jax.random.uniform(
            k1, (2 * HIDDEN_CHANNELS, IN_CHANNELS, KERNEL_SIZE), jnp.float32, -b_conv, b_conv))
        bconv.append(jax.random.uniform(
            k2, (2 * HIDDEN_CHANNELS,), jnp.float32, -b_conv, b_conv))
        wskip.append(jax.random.uniform(
            k3, (SKIP_CHANNELS, HIDDEN_CHANNELS), jnp.float32, -b_1x1, b_1x1))
        bskip.append(jax.random.uniform(
            k4, (SKIP_CHANNELS,), jnp.float32, -b_1x1, b_1x1))
        wout.append(jax.random.uniform(
            k5, (IN_CHANNELS, HIDDEN_CHANNELS), jnp.float32, -b_1x1, b_1x1))
        bout.append(jax.random.uniform(
            k6, (IN_CHANNELS,), jnp.float32, -b_1x1, b_1x1))
    return dict(wconv=jnp.stack(wconv), bconv=jnp.stack(bconv),
                wskip=jnp.stack(wskip), bskip=jnp.stack(bskip),
                wout=jnp.stack(wout), bout=jnp.stack(bout))


# ---------------------- pure-JAX reference (NCW, like PyTorch) -----------------
def reference_forward(x_bct, params):
    """Matches the kernel's quantization points (bf16 matmul operands, f32 accumulation)."""
    x = x_bct.astype(jnp.float32)
    B, _, T = x.shape
    skip_acc = jnp.zeros((B, SKIP_CHANNELS, T), jnp.float32)
    for layer in range(NUM_LAYERS):
        d = 2 ** layer if DILATED else 1
        pad = (KERNEL_SIZE - 1) * d
        xp = jnp.pad(x, ((0, 0), (0, 0), (pad, 0)))  # causal left pad
        h = jax.lax.conv_general_dilated(
            xp.astype(jnp.bfloat16), params["wconv"][layer].astype(jnp.bfloat16),
            window_strides=(1,), padding="VALID", rhs_dilation=(d,),
            dimension_numbers=("NCH", "OIH", "NCH"),
            preferred_element_type=jnp.float32)
        h = h + params["bconv"][layer][None, :, None]
        z = jnp.tanh(h[:, :HIDDEN_CHANNELS]) * jax.nn.sigmoid(h[:, HIDDEN_CHANNELS:])
        zb = z.astype(jnp.bfloat16)
        skip = jnp.einsum("bht,oh->bot", zb, params["wskip"][layer].astype(jnp.bfloat16),
                          preferred_element_type=jnp.float32) \
            + params["bskip"][layer][None, :, None]
        out = jnp.einsum("bht,oh->bot", zb, params["wout"][layer].astype(jnp.bfloat16),
                         preferred_element_type=jnp.float32) \
            + params["bout"][layer][None, :, None]
        x = out + x
        skip_acc = skip_acc + skip
    return x, skip_acc


# ------------------------------------ main -------------------------------------
if __name__ == "__main__":
    key = jax.random.PRNGKey(0)
    kx, kp = jax.random.split(key)
    x = jax.random.normal(kx, (BATCH, IN_CHANNELS, NUM_FRAMES), jnp.float32)
    params = init_params(kp)
    kparams = pack_params(params)   # static per model; done once, outside the forward path

    out, skip = stacked_residual_conv_block1d(x, kparams)
    out, skip = jax.block_until_ready((out, skip))

    assert out.shape == (BATCH, IN_CHANNELS, NUM_FRAMES)
    assert skip.shape == (BATCH, SKIP_CHANNELS, NUM_FRAMES)

    out_ref, skip_ref = reference_forward(x, params)
    # bf16 cast points match the kernel; slack covers f32 summation-order / rare ulp flips.
    np.testing.assert_allclose(np.asarray(out), np.asarray(out_ref), rtol=1e-2, atol=1e-2)
    np.testing.assert_allclose(np.asarray(skip), np.asarray(skip_ref), rtol=1e-2, atol=1e-2)

    print("KERNEL_OK")
</pallas_src>

<mosaic_0001>
module attributes {stable_mosaic.version = 11 : i64} {
  func.func @stacked_residual_kernel(%arg0: i32, %arg1: memref<1x8x128xf32, #tpu.memory_space<vmem>>, %arg2: memref<4x32x24xbf16, #tpu.memory_space<vmem>>, %arg3: memref<4x32x1xf32, #tpu.memory_space<vmem>>, %arg4: memref<4x24x16xbf16, #tpu.memory_space<vmem>>, %arg5: memref<4x24x1xf32, #tpu.memory_space<vmem>>, %arg6: memref<1x8x128xf32, #tpu.memory_space<vmem>>, %arg7: memref<1x16x128xf32, #tpu.memory_space<vmem>>) attributes {dimension_semantics = [#tpu.dimension_semantics<parallel>], iteration_bounds = array<i64: 2>, scalar_prefetch = 0 : i64, scratch_operands = 0 : i64, tpu.core_type = #tpu.core_type<tc>, window_params = [{transform_indices = @transform_0, window_bounds = array<i64: 1, 8, 128>}, {pipeline_mode = #tpu.pipeline_mode<synchronous>, transform_indices = @transform_1, window_bounds = array<i64: 4, 32, 24>}, {pipeline_mode = #tpu.pipeline_mode<synchronous>, transform_indices = @transform_2, window_bounds = array<i64: 4, 32, 1>}, {pipeline_mode = #tpu.pipeline_mode<synchronous>, transform_indices = @transform_3, window_bounds = array<i64: 4, 24, 16>}, {pipeline_mode = #tpu.pipeline_mode<synchronous>, transform_indices = @transform_4, window_bounds = array<i64: 4, 24, 1>}, {transform_indices = @transform_5, window_bounds = array<i64: 1, 8, 128>}, {transform_indices = @transform_6, window_bounds = array<i64: 1, 16, 128>}]} {
    %c0 = arith.constant 0 : index
    %c0_0 = arith.constant 0 : index
    %c0_1 = arith.constant 0 : index
    %0 = vector.load %arg1[%c0, %c0_0, %c0_1] : memref<1x8x128xf32, #tpu.memory_space<vmem>>, vector<1x8x128xf32>
    %1 = vector.shape_cast %0 : vector<1x8x128xf32> to vector<8x128xf32>
    %cst = arith.constant 0.000000e+00 : f32
    %2 = vector.broadcast %cst : f32 to vector<16x128xf32>
    %3 = tpu.iota {dimensions = array<i32: 1>} : vector<8x128xi32>
    %c2_i32 = arith.constant 2 : i32
    %4 = vector.broadcast %c2_i32 : i32 to vector<8x128xi32>
    %5 = arith.cmpi sge, %3, %4 : vector<8x128xi32>
    %c2_i32_2 = arith.constant 2 : i32
    %6 = tpu.dynamic_rotate %1 by %c2_i32_2 dim 1 : vector<8x128xf32>, i32 -> vector<8x128xf32>
    %cst_3 = arith.constant 0.000000e+00 : f32
    %7 = vector.broadcast %cst_3 : f32 to vector<8x128xf32>
    %8 = arith.select %5, %6, %7 : vector<8x128xi1>, vector<8x128xf32>
    %c1_i32 = arith.constant 1 : i32
    %9 = vector.broadcast %c1_i32 : i32 to vector<8x128xi32>
    %10 = arith.cmpi sge, %3, %9 : vector<8x128xi32>
    %c1_i32_4 = arith.constant 1 : i32
    %11 = tpu.dynamic_rotate %1 by %c1_i32_4 dim 1 : vector<8x128xf32>, i32 -> vector<8x128xf32>
    %cst_5 = arith.constant 0.000000e+00 : f32
    %12 = vector.broadcast %cst_5 : f32 to vector<8x128xf32>
    %13 = arith.select %10, %11, %12 : vector<8x128xi1>, vector<8x128xf32>
    %14 = tpu.concatenate %8, %13, %1 in 0 : vector<8x128xf32>, vector<8x128xf32>, vector<8x128xf32> -> vector<24x128xf32>
    %15 = arith.truncf %14 : vector<24x128xf32> to vector<24x128xbf16>
    %c0_6 = arith.constant 0 : index
    %c0_7 = arith.constant 0 : index
    %c0_8 = arith.constant 0 : index
    %16 = vector.load %arg2[%c0_6, %c0_7, %c0_8] : memref<4x32x24xbf16, #tpu.memory_space<vmem>>, vector<1x32x24xbf16>
    %17 = vector.shape_cast %16 : vector<1x32x24xbf16> to vector<32x24xbf16>
    %cst_9 = arith.constant dense<0.000000e+00> : vector<32x128xf32>
    %18 = tpu.matmul %17, %15, %cst_9 {dimension_numbers = #tpu.dot_dimension_numbers<[1], [0], [0], [1], [0, 0, 1, 1], [], []>} : vector<32x24xbf16>, vector<24x128xbf16>, vector<32x128xf32> -> vector<32x128xf32>
    %c0_10 = arith.constant 0 : index
    %c0_11 = arith.constant 0 : index
    %c0_12 = arith.constant 0 : index
    %19 = vector.load %arg3[%c0_10, %c0_11, %c0_12] : memref<4x32x1xf32, #tpu.memory_space<vmem>>, vector<1x32x1xf32>
    %20 = vector.shape_cast %19 : vector<1x32x1xf32> to vector<32x1xf32>
    %21 = vector.broadcast %20 : vector<32x1xf32> to vector<32x128xf32>
    %22 = arith.addf %18, %21 : vector<32x128xf32>
    %23 = vector.extract_strided_slice %22 {offsets = [0, 0], sizes = [16, 128], strides = [1, 1]} : vector<32x128xf32> to vector<16x128xf32>
    %24 = math.tanh %23 : vector<16x128xf32>
    %25 = vector.extract_strided_slice %22 {offsets = [16, 0], sizes = [16, 128], strides = [1, 1]} : vector<32x128xf32> to vector<16x128xf32>
    %26 = arith.negf %25 : vector<16x128xf32>
    %27 = math.exp %26 : vector<16x128xf32>
    %cst_13 = arith.constant 1.000000e+00 : f32
    %28 = vector.broadcast %cst_13 : f32 to vector<16x128xf32>
    %29 = arith.addf %28, %27 : vector<16x128xf32>
    %30 = arith.divf %28, %29 : vector<16x128xf32>
    %31 = arith.mulf %24, %30 : vector<16x128xf32>
    %c0_14 = arith.constant 0 : index
    %c0_15 = arith.constant 0 : index
    %c0_16 = arith.constant 0 : index
    %32 = vector.load %arg4[%c0_14, %c0_15, %c0_16] : memref<4x24x16xbf16, #tpu.memory_space<vmem>>, vector<1x24x16xbf16>
    %33 = vector.shape_cast %32 : vector<1x24x16xbf16> to vector<24x16xbf16>
    %34 = arith.truncf %31 : vector<16x128xf32> to vector<16x128xbf16>
    %cst_17 = arith.constant dense<0.000000e+00> : vector<24x128xf32>
    %35 = tpu.matmul %33, %34, %cst_17 {dimension_numbers = #tpu.dot_dimension_numbers<[1], [0], [0], [1], [0, 0, 1, 1], [], []>} : vector<24x16xbf16>, vector<16x128xbf16>, vector<24x128xf32> -> vector<24x128xf32>
    %c0_18 = arith.constant 0 : index
    %c0_19 = arith.constant 0 : index
    %c0_20 = arith.constant 0 : index
    %36 = vector.load %arg5[%c0_18, %c0_19, %c0_20] : memref<4x24x1xf32, #tpu.memory_space<vmem>>, vector<1x24x1xf32>
    %37 = vector.shape_cast %36 : vector<1x24x1xf32> to vector<24x1xf32>
    %38 = vector.broadcast %37 : vector<24x1xf32> to vector<24x128xf32>
    %39 = arith.addf %35, %38 : vector<24x128xf32>
    %40 = vector.extract_strided_slice %39 {offsets = [0, 0], sizes = [16, 128], strides = [1, 1]} : vector<24x128xf32> to vector<16x128xf32>
    %41 = arith.addf %2, %40 : vector<16x128xf32>
    %42 = vector.extract_strided_slice %39 {offsets = [16, 0], sizes = [8, 128], strides = [1, 1]} : vector<24x128xf32> to vector<8x128xf32>
    %43 = arith.addf %1, %42 : vector<8x128xf32>
    %c4_i32 = arith.constant 4 : i32
    %44 = vector.broadcast %c4_i32 : i32 to vector<8x128xi32>
    %45 = arith.cmpi sge, %3, %44 : vector<8x128xi32>
    %c4_i32_21 = arith.constant 4 : i32
    %46 = tpu.dynamic_rotate %43 by %c4_i32_21 dim 1 : vector<8x128xf32>, i32 -> vector<8x128xf32>
    %cst_22 = arith.constant 0.000000e+00 : f32
    %47 = vector.broadcast %cst_22 : f32 to vector<8x128xf32>
    %48 = arith.select %45, %46, %47 : vector<8x128xi1>, vector<8x128xf32>
    %c2_i32_23 = arith.constant 2 : i32
    %49 = tpu.dynamic_rotate %43 by %c2_i32_23 dim 1 : vector<8x128xf32>, i32 -> vector<8x128xf32>
    %cst_24 = arith.constant 0.000000e+00 : f32
    %50 = vector.broadcast %cst_24 : f32 to vector<8x128xf32>
    %51 = arith.select %5, %49, %50 : vector<8x128xi1>, vector<8x128xf32>
    %52 = tpu.concatenate %48, %51, %43 in 0 : vector<8x128xf32>, vector<8x128xf32>, vector<8x128xf32> -> vector<24x128xf32>
    %53 = arith.truncf %52 : vector<24x128xf32> to vector<24x128xbf16>
    %c1 = arith.constant 1 : index
    %c0_25 = arith.constant 0 : index
    %c0_26 = arith.constant 0 : index
    %54 = vector.load %arg2[%c1, %c0_25, %c0_26] : memref<4x32x24xbf16, #tpu.memory_space<vmem>>, vector<1x32x24xbf16>
    %55 = vector.shape_cast %54 : vector<1x32x24xbf16> to vector<32x24xbf16>
    %cst_27 = arith.constant dense<0.000000e+00> : vector<32x128xf32>
    %56 = tpu.matmul %55, %53, %cst_27 {dimension_numbers = #tpu.dot_dimension_numbers<[1], [0], [0], [1], [0, 0, 1, 1], [], []>} : vector<32x24xbf16>, vector<24x128xbf16>, vector<32x128xf32> -> vector<32x128xf32>
    %c1_28 = arith.constant 1 : index
    %c0_29 = arith.constant 0 : index
    %c0_30 = arith.constant 0 : index
    %57 = vector.load %arg3[%c1_28, %c0_29, %c0_30] : memref<4x32x1xf32, #tpu.memory_space<vmem>>, vector<1x32x1xf32>
    %58 = vector.shape_cast %57 : vector<1x32x1xf32> to vector<32x1xf32>
    %59 = vector.broadcast %58 : vector<32x1xf32> to vector<32x128xf32>
    %60 = arith.addf %56, %59 : vector<32x128xf32>
    %61 = vector.extract_strided_slice %60 {offsets = [0, 0], sizes = [16, 128], strides = [1, 1]} : vector<32x128xf32> to vector<16x128xf32>
    %62 = math.tanh %61 : vector<16x128xf32>
    %63 = vector.extract_strided_slice %60 {offsets = [16, 0], sizes = [16, 128], strides = [1, 1]} : vector<32x128xf32> to vector<16x128xf32>
    %64 = arith.negf %63 : vector<16x128xf32>
    %65 = math.exp %64 : vector<16x128xf32>
    %cst_31 = arith.constant 1.000000e+00 : f32
    %66 = vector.broadcast %cst_31 : f32 to vector<16x128xf32>
    %67 = arith.addf %66, %65 : vector<16x128xf32>
    %68 = arith.divf %66, %67 : vector<16x128xf32>
    %69 = arith.mulf %62, %68 : vector<16x128xf32>
    %c1_32 = arith.constant 1 : index
    %c0_33 = arith.constant 0 : index
    %c0_34 = arith.constant 0 : index
    %70 = vector.load %arg4[%c1_32, %c0_33, %c0_34] : memref<4x24x16xbf16, #tpu.memory_space<vmem>>, vector<1x24x16xbf16>
    %71 = vector.shape_cast %70 : vector<1x24x16xbf16> to vector<24x16xbf16>
    %72 = arith.truncf %69 : vector<16x128xf32> to vector<16x128xbf16>
    %cst_35 = arith.constant dense<0.000000e+00> : vector<24x128xf32>
    %73 = tpu.matmul %71, %72, %cst_35 {dimension_numbers = #tpu.dot_dimension_numbers<[1], [0], [0], [1], [0, 0, 1, 1], [], []>} : vector<24x16xbf16>, vector<16x128xbf16>, vector<24x128xf32> -> vector<24x128xf32>
    %c1_36 = arith.constant 1 : index
    %c0_37 = arith.constant 0 : index
    %c0_38 = arith.constant 0 : index
    %74 = vector.load %arg5[%c1_36, %c0_37, %c0_38] : memref<4x24x1xf32, #tpu.memory_space<vmem>>, vector<1x24x1xf32>
    %75 = vector.shape_cast %74 : vector<1x24x1xf32> to vector<24x1xf32>
    %76 = vector.broadcast %75 : vector<24x1xf32> to vector<24x128xf32>
    %77 = arith.addf %73, %76 : vector<24x128xf32>
    %78 = vector.extract_strided_slice %77 {offsets = [0, 0], sizes = [16, 128], strides = [1, 1]} : vector<24x128xf32> to vector<16x128xf32>
    %79 = arith.addf %41, %78 : vector<16x128xf32>
    %80 = vector.extract_strided_slice %77 {offsets = [16, 0], sizes = [8, 128], strides = [1, 1]} : vector<24x128xf32> to vector<8x128xf32>
    %81 = arith.addf %43, %80 : vector<8x128xf32>
    %c8_i32 = arith.constant 8 : i32
    %82 = vector.broadcast %c8_i32 : i32 to vector<8x128xi32>
    %83 = arith.cmpi sge, %3, %82 : vector<8x128xi32>
    %c8_i32_39 = arith.constant 8 : i32
    %84 = tpu.dynamic_rotate %81 by %c8_i32_39 dim 1 : vector<8x128xf32>, i32 -> vector<8x128xf32>
    %cst_40 = arith.constant 0.000000e+00 : f32
    %85 = vector.broadcast %cst_40 : f32 to vector<8x128xf32>
    %86 = arith.select %83, %84, %85 : vector<8x128xi1>, vector<8x128xf32>
    %c4_i32_41 = arith.constant 4 : i32
    %87 = tpu.dynamic_rotate %81 by %c4_i32_41 dim 1 : vector<8x128xf32>, i32 -> vector<8x128xf32>
    %cst_42 = arith.constant 0.000000e+00 : f32
    %88 = vector.broadcast %cst_42 : f32 to vector<8x128xf32>
    %89 = arith.select %45, %87, %88 : vector<8x128xi1>, vector<8x128xf32>
    %90 = tpu.concatenate %86, %89, %81 in 0 : vector<8x128xf32>, vector<8x128xf32>, vector<8x128xf32> -> vector<24x128xf32>
    %91 = arith.truncf %90 : vector<24x128xf32> to vector<24x128xbf16>
    %c2 = arith.constant 2 : index
    %c0_43 = arith.constant 0 : index
    %c0_44 = arith.constant 0 : index
    %92 = vector.load %arg2[%c2, %c0_43, %c0_44] : memref<4x32x24xbf16, #tpu.memory_space<vmem>>, vector<1x32x24xbf16>
    %93 = vector.shape_cast %92 : vector<1x32x24xbf16> to vector<32x24xbf16>
    %cst_45 = arith.constant dense<0.000000e+00> : vector<32x128xf32>
    %94 = tpu.matmul %93, %91, %cst_45 {dimension_numbers = #tpu.dot_dimension_numbers<[1], [0], [0], [1], [0, 0, 1, 1], [], []>} : vector<32x24xbf16>, vector<24x128xbf16>, vector<32x128xf32> -> vector<32x128xf32>
    %c2_46 = arith.constant 2 : index
    %c0_47 = arith.constant 0 : index
    %c0_48 = arith.constant 0 : index
    %95 = vector.load %arg3[%c2_46, %c0_47, %c0_48] : memref<4x32x1xf32, #tpu.memory_space<vmem>>, vector<1x32x1xf32>
    %96 = vector.shape_cast %95 : vector<1x32x1xf32> to vector<32x1xf32>
    %97 = vector.broadcast %96 : vector<32x1xf32> to vector<32x128xf32>
    %98 = arith.addf %94, %97 : vector<32x128xf32>
    %99 = vector.extract_strided_slice %98 {offsets = [0, 0], sizes = [16, 128], strides = [1, 1]} : vector<32x128xf32> to vector<16x128xf32>
    %100 = math.tanh %99 : vector<16x128xf32>
    %101 = vector.extract_strided_slice %98 {offsets = [16, 0], sizes = [16, 128], strides = [1, 1]} : vector<32x128xf32> to vector<16x128xf32>
    %102 = arith.negf %101 : vector<16x128xf32>
    %103 = math.exp %102 : vector<16x128xf32>
    %cst_49 = arith.constant 1.000000e+00 : f32
    %104 = vector.broadcast %cst_49 : f32 to vector<16x128xf32>
    %105 = arith.addf %104, %103 : vector<16x128xf32>
    %106 = arith.divf %104, %105 : vector<16x128xf32>
    %107 = arith.mulf %100, %106 : vector<16x128xf32>
    %c2_50 = arith.constant 2 : index
    %c0_51 = arith.constant 0 : index
    %c0_52 = arith.constant 0 : index
    %108 = vector.load %arg4[%c2_50, %c0_51, %c0_52] : memref<4x24x16xbf16, #tpu.memory_space<vmem>>, vector<1x24x16xbf16>
    %109 = vector.shape_cast %108 : vector<1x24x16xbf16> to vector<24x16xbf16>
    %110 = arith.truncf %107 : vector<16x128xf32> to vector<16x128xbf16>
    %cst_53 = arith.constant dense<0.000000e+00> : vector<24x128xf32>
    %111 = tpu.matmul %109, %110, %cst_53 {dimension_numbers = #tpu.dot_dimension_numbers<[1], [0], [0], [1], [0, 0, 1, 1], [], []>} : vector<24x16xbf16>, vector<16x128xbf16>, vector<24x128xf32> -> vector<24x128xf32>
    %c2_54 = arith.constant 2 : index
    %c0_55 = arith.constant 0 : index
    %c0_56 = arith.constant 0 : index
    %112 = vector.load %arg5[%c2_54, %c0_55, %c0_56] : memref<4x24x1xf32, #tpu.memory_space<vmem>>, vector<1x24x1xf32>
    %113 = vector.shape_cast %112 : vector<1x24x1xf32> to vector<24x1xf32>
    %114 = vector.broadcast %113 : vector<24x1xf32> to vector<24x128xf32>
    %115 = arith.addf %111, %114 : vector<24x128xf32>
    %116 = vector.extract_strided_slice %115 {offsets = [0, 0], sizes = [16, 128], strides = [1, 1]} : vector<24x128xf32> to vector<16x128xf32>
    %117 = arith.addf %79, %116 : vector<16x128xf32>
    %118 = vector.extract_strided_slice %115 {offsets = [16, 0], sizes = [8, 128], strides = [1, 1]} : vector<24x128xf32> to vector<8x128xf32>
    %119 = arith.addf %81, %118 : vector<8x128xf32>
    %c16_i32 = arith.constant 16 : i32
    %120 = vector.broadcast %c16_i32 : i32 to vector<8x128xi32>
    %121 = arith.cmpi sge, %3, %120 : vector<8x128xi32>
    %c16_i32_57 = arith.constant 16 : i32
    %122 = tpu.dynamic_rotate %119 by %c16_i32_57 dim 1 : vector<8x128xf32>, i32 -> vector<8x128xf32>
    %cst_58 = arith.constant 0.000000e+00 : f32
    %123 = vector.broadcast %cst_58 : f32 to vector<8x128xf32>
    %124 = arith.select %121, %122, %123 : vector<8x128xi1>, vector<8x128xf32>
    %c8_i32_59 = arith.constant 8 : i32
    %125 = tpu.dynamic_rotate %119 by %c8_i32_59 dim 1 : vector<8x128xf32>, i32 -> vector<8x128xf32>
    %cst_60 = arith.constant 0.000000e+00 : f32
    %126 = vector.broadcast %cst_60 : f32 to vector<8x128xf32>
    %127 = arith.select %83, %125, %126 : vector<8x128xi1>, vector<8x128xf32>
    %128 = tpu.concatenate %124, %127, %119 in 0 : vector<8x128xf32>, vector<8x128xf32>, vector<8x128xf32> -> vector<24x128xf32>
    %129 = arith.truncf %128 : vector<24x128xf32> to vector<24x128xbf16>
    %c3 = arith.constant 3 : index
    %c0_61 = arith.constant 0 : index
    %c0_62 = arith.constant 0 : index
    %130 = vector.load %arg2[%c3, %c0_61, %c0_62] : memref<4x32x24xbf16, #tpu.memory_space<vmem>>, vector<1x32x24xbf16>
    %131 = vector.shape_cast %130 : vector<1x32x24xbf16> to vector<32x24xbf16>
    %cst_63 = arith.constant dense<0.000000e+00> : vector<32x128xf32>
    %132 = tpu.matmul %131, %129, %cst_63 {dimension_numbers = #tpu.dot_dimension_numbers<[1], [0], [0], [1], [0, 0, 1, 1], [], []>} : vector<32x24xbf16>, vector<24x128xbf16>, vector<32x128xf32> -> vector<32x128xf32>
    %c3_64 = arith.constant 3 : index
    %c0_65 = arith.constant 0 : index
    %c0_66 = arith.constant 0 : index
    %133 = vector.load %arg3[%c3_64, %c0_65, %c0_66] : memref<4x32x1xf32, #tpu.memory_space<vmem>>, vector<1x32x1xf32>
    %134 = vector.shape_cast %133 : vector<1x32x1xf32> to vector<32x1xf32>
    %135 = vector.broadcast %134 : vector<32x1xf32> to vector<32x128xf32>
    %136 = arith.addf %132, %135 : vector<32x128xf32>
    %137 = vector.extract_strided_slice %136 {offsets = [0, 0], sizes = [16, 128], strides = [1, 1]} : vector<32x128xf32> to vector<16x128xf32>
    %138 = math.tanh %137 : vector<16x128xf32>
    %139 = vector.extract_strided_slice %136 {offsets = [16, 0], sizes = [16, 128], strides = [1, 1]} : vector<32x128xf32> to vector<16x128xf32>
    %140 = arith.negf %139 : vector<16x128xf32>
    %141 = math.exp %140 : vector<16x128xf32>
    %cst_67 = arith.constant 1.000000e+00 : f32
    %142 = vector.broadcast %cst_67 : f32 to vector<16x128xf32>
    %143 = arith.addf %142, %141 : vector<16x128xf32>
    %144 = arith.divf %142, %143 : vector<16x128xf32>
    %145 = arith.mulf %138, %144 : vector<16x128xf32>
    %c3_68 = arith.constant 3 : index
    %c0_69 = arith.constant 0 : index
    %c0_70 = arith.constant 0 : index
    %146 = vector.load %arg4[%c3_68, %c0_69, %c0_70] : memref<4x24x16xbf16, #tpu.memory_space<vmem>>, vector<1x24x16xbf16>
    %147 = vector.shape_cast %146 : vector<1x24x16xbf16> to vector<24x16xbf16>
    %148 = arith.truncf %145 : vector<16x128xf32> to vector<16x128xbf16>
    %cst_71 = arith.constant dense<0.000000e+00> : vector<24x128xf32>
    %149 = tpu.matmul %147, %148, %cst_71 {dimension_numbers = #tpu.dot_dimension_numbers<[1], [0], [0], [1], [0, 0, 1, 1], [], []>} : vector<24x16xbf16>, vector<16x128xbf16>, vector<24x128xf32> -> vector<24x128xf32>
    %c3_72 = arith.constant 3 : index
    %c0_73 = arith.constant 0 : index
    %c0_74 = arith.constant 0 : index
    %150 = vector.load %arg5[%c3_72, %c0_73, %c0_74] : memref<4x24x1xf32, #tpu.memory_space<vmem>>, vector<1x24x1xf32>
    %151 = vector.shape_cast %150 : vector<1x24x1xf32> to vector<24x1xf32>
    %152 = vector.broadcast %151 : vector<24x1xf32> to vector<24x128xf32>
    %153 = arith.addf %149, %152 : vector<24x128xf32>
    %154 = vector.extract_strided_slice %153 {offsets = [0, 0], sizes = [16, 128], strides = [1, 1]} : vector<24x128xf32> to vector<16x128xf32>
    %155 = arith.addf %117, %154 : vector<16x128xf32>
    %156 = vector.extract_strided_slice %153 {offsets = [16, 0], sizes = [8, 128], strides = [1, 1]} : vector<24x128xf32> to vector<8x128xf32>
    %157 = arith.addf %119, %156 : vector<8x128xf32>
    %c0_75 = arith.constant 0 : index
    %c0_76 = arith.constant 0 : index
    %c0_77 = arith.constant 0 : index
    %158 = vector.load %arg6[%c0_75, %c0_76, %c0_77] : memref<1x8x128xf32, #tpu.memory_space<vmem>>, vector<1x8x128xf32>
    %159 = vector.shape_cast %158 : vector<1x8x128xf32> to vector<8x128xf32>
    %160 = vector.shape_cast %157 : vector<8x128xf32> to vector<1x8x128xf32>
    tpu.vector_store %arg6[%c0_75, %c0_76, %c0_77], %160 {strides = array<i32>} : memref<1x8x128xf32, #tpu.memory_space<vmem>>, vector<1x8x128xf32>,
    %c0_78 = arith.constant 0 : index
    %c0_79 = arith.constant 0 : index
    %c0_80 = arith.constant 0 : index
    %161 = vector.load %arg7[%c0_78, %c0_79, %c0_80] : memref<1x16x128xf32, #tpu.memory_space<vmem>>, vector<1x16x128xf32>
    %162 = vector.shape_cast %161 : vector<1x16x128xf32> to vector<16x128xf32>
    %163 = vector.shape_cast %155 : vector<16x128xf32> to vector<1x16x128xf32>
    tpu.vector_store %arg7[%c0_78, %c0_79, %c0_80], %163 {strides = array<i32>} : memref<1x16x128xf32, #tpu.memory_space<vmem>>, vector<1x16x128xf32>,
    return
  }
  func.func @transform_0(%arg0: i32) -> (i32, i32, i32) {
    %c0_i32 = arith.constant 0 : i32
    %c0_i32_0 = arith.constant 0 : i32
    %c0_i32_1 = arith.constant 0 : i32
    return %arg0, %c0_i32, %c0_i32_0 : i32, i32, i32
  }
  func.func @transform_1(%arg0: i32) -> (i32, i32, i32) {
    %c0_i32 = arith.constant 0 : i32
    %c0_i32_0 = arith.constant 0 : i32
    %c0_i32_1 = arith.constant 0 : i32
    %c0_i32_2 = arith.constant 0 : i32
    return %c0_i32, %c0_i32_0, %c0_i32_1 : i32, i32, i32
  }
  func.func @transform_2(%arg0: i32) -> (i32, i32, i32) {
    %c0_i32 = arith.constant 0 : i32
    %c0_i32_0 = arith.constant 0 : i32
    %c0_i32_1 = arith.constant 0 : i32
    %c0_i32_2 = arith.constant 0 : i32
    return %c0_i32, %c0_i32_0, %c0_i32_1 : i32, i32, i32
  }
  func.func @transform_3(%arg0: i32) -> (i32, i32, i32) {
    %c0_i32 = arith.constant 0 : i32
    %c0_i32_0 = arith.constant 0 : i32
    %c0_i32_1 = arith.constant 0 : i32
    %c0_i32_2 = arith.constant 0 : i32
    return %c0_i32, %c0_i32_0, %c0_i32_1 : i32, i32, i32
  }
  func.func @transform_4(%arg0: i32) -> (i32, i32, i32) {
    %c0_i32 = arith.constant 0 : i32
    %c0_i32_0 = arith.constant 0 : i32
    %c0_i32_1 = arith.constant 0 : i32
    %c0_i32_2 = arith.constant 0 : i32
    return %c0_i32, %c0_i32_0, %c0_i32_1 : i32, i32, i32
  }
  func.func @transform_5(%arg0: i32) -> (i32, i32, i32) {
    %c0_i32 = arith.constant 0 : i32
    %c0_i32_0 = arith.constant 0 : i32
    %c0_i32_1 = arith.constant 0 : i32
    return %arg0, %c0_i32, %c0_i32_0 : i32, i32, i32
  }
  func.func @transform_6(%arg0: i32) -> (i32, i32, i32) {
    %c0_i32 = arith.constant 0 : i32
    %c0_i32_0 = arith.constant 0 : i32
    %c0_i32_1 = arith.constant 0 : i32
    return %arg0, %c0_i32, %c0_i32_0 : i32, i32, i32
  }
}

</mosaic_0001>

<bundles_post_ra>
// kernel: tpu_custom_call.1
= control target key start
LH: loop header
LB: loop body
LE: loop exit
PB: predicated region body
PF: predicated region fallthrough
CT: control target
= control target key end

     0   :  { %12 = vsyncpa [#allocation3], 0  ;;  %s2060_s0 = inlined_call_operand.vmem [shape: f32[2,8,128], index: 0, kind: input, shape index: {}]   ;;  %s2061_s1 = inlined_call_operand.vmem [shape: bf16[4,32,24], index: 1, kind: input, shape index: {}]   ;;  %s2062_s2 = inlined_call_operand.vmem [shape: f32[4,32,1], index: 2, kind: input, shape index: {}]   ;;  %s2063_s3 = inlined_call_operand.vmem [shape: bf16[4,24,16], index: 3, kind: input, shape index: {}]   ;;  %s2064_s4 = inlined_call_operand.vmem [shape: f32[4,24,1], index: 4, kind: input, shape index: {}]   ;;  %s2065_s5 = inlined_call_operand.hbm [shape: f32[2,8,128], index: 5, kind: output, shape index: {0}]   ;;  %s2066_s6 = inlined_call_operand.hbm [shape: f32[2,16,128], index: 6, kind: output, shape index: {1}]  }
   0x1   :  { %14 = vsyncpa [#allocation3 + $0x1], 0 }
   0x2   :  { %15 = vsyncpa [#allocation5], 0 }
   0x3   :  { %17 = vsyncpa [#allocation5 + $0x1], 0  ;;  %s1693_s21 = smov 0   ;;  %s1695_s22 = smov 0  }
   0x4   :  { %s1697_s23 = smov 0   ;;  %s1699_s24 = smov 0  }
   0x5 LB: > { %s1714_s25 = sadd.s32 4294967295, %s1647_s24   ;;  %s1239_s26 = sadd.s32 4294967294, %s1647_s24   ;;  %s1647_s24 = sphi %s1699_s24, %s2072_s24   ;;  %s1643_s23 = sphi %s1697_s23, %s2071_s23   ;;  %s1639_s22 = sphi %s1695_s22, %s2070_s22   ;;  %s1635_s21 = sphi %s1693_s21, %s2069_s21  }
   0x6   : > { %s1718_s27 = sadd.s32 1, %s1647_s24   ;;  %s140_s28 = sadd.s32 1, %s1643_s23 }
   0x7   : > { %s137_s29 = ssub.s32 %s1647_s24, %s1718_s27  ;;  %p150_p0 = scmp.ne.s32.totalorder %s1643_s23, %s1639_s22 }
   0x8   : > { %p138_p1 = scmp.eq.s32.totalorder %s137_s29, 0  ;;  %p151_p2 = scmp.eq.s32.totalorder %s1714_s25, 1 }
   0x9   : > { %p156_p3 = scmp.ne.s32.totalorder %s1639_s22, %s1635_s21  ;;  %p157_p4 = scmp.eq.s32.totalorder %s1239_s26, 1 }
   0xa   : > { %s1729_s30 = scalar_select %p138_p1, %s1643_s23, %s140_s28  }
   0xb   : > { %p1731_p5 = por %p151_p2, %p150_p0  ;;  %p1735_p6 = por %p157_p4, %p156_p3 }
   0xc   : > { %p1242_p7 = scmp.ge.s32.totalorder %s1647_s24, 1  ;;  %p220_p8 = scmp.lt.s32.totalorder %s1647_s24, 3 }
   0xe   : > { %p221_p9 = pnand %p1242_p7, %p220_p8 }
   0xf   : > { %p254_p10 = scmp.lt.s32.totalorder (!%p221_p9), %s1714_s25, 1  ;;  %v1489_v0 = vld [vmem:[%s2061_s1] sm:$0xff] (!%p221_p9)   ;;  %vm310_vm0 = vcmask (!%p221_p9), 195584   ;;  %s1649_s16 = smov (!%p221_p9), 2   ;;  %v278_v2 = vld [vmem:[%s2062_s2 + $0x10] sm:$0xff] (!%p221_p9)  ;;  %v1650_v3 = vmov (!%p221_p9), 0   ;;  %v260_v8 = vlaneseq (!%p221_p9) }
  0x10   : > { %224 = sbr.rel (%p221_p9) target bundleno = 2435 (0x983), region = 40  ;;  %1380 = vmatprep.mubr.msk.bf16.mxu0 (!%p221_p9), %vm310_vm0, %v1489_v0  ;;  %1487 = vset.pattern.permute.xlu1 (!%p221_p9), %v1650_v3  ;;  %v279_v4 = vld [vmem:[%s2062_s2 + $0x18] sm:$0xff] (!%p221_p9)  ;;  %v276_v5 = vld [vmem:[%s2062_s2] sm:$0xff] (!%p221_p9)  ;;  %s1651_s29 = smov (!%p221_p9), 1   ;;  %v277_v6 = vld [vmem:[%s2062_s2 + $0x8] sm:$0xff] (!%p221_p9)  ;;  %vm317_vm4 = vcmask (!%p221_p9), 1043456  }
  0x11   : > { %1488 = vset.pattern.permute.xlu0 (!%p221_p9), %v1650_v3  ;;  %292 = vperm.xlu1 (!%p221_p9), %1487, %v278_v2   ;;  %v392_v7 = vld [vmem:[%s2064_s4 + $0x10] sm:$0xff] (!%p221_p9)  ;;  %v1770_v9 = vand.u32 (!%p221_p9), 127, %v260_v8  ;;  %v1490_v15 = vld [vmem:[%s2061_s1 + $0x8] sm:$0xff] (!%p221_p9)   ;;  %v1491_v16 = vld [vmem:[%s2063_s3] sm:$0xff] (!%p221_p9)   ;;  %vm416_vm5 = vcmask (!%p221_p9), 130048   ;;  %s1652_s28 = smov (!%p221_p9), 4  }
  0x12   : > { %1386 = vmatprep.mubr.msk.bf16.mxu1 (!%p221_p9), %vm416_vm5, %v1491_v16  ;;  %v1492_v42 = vld [vmem:[%s2063_s3 + $0x8] ss:$0 sps:$4 sm:$0xff] (!%p221_p9)   ;;  %v1493_v43 = vld [vmem:[%s2061_s1 + $0x10] sm:$0xff] (!%p221_p9)   ;;  %v1266_v51 = vld [vmem:[%s2062_s2 + $0x38] sm:$0xff] (!%p221_p9)  ;;  %s1653_s12 = smov (!%p221_p9), 8   ;;  %s1654_s17 = smov (!%p221_p9), 16  }
  0x13   : > { %vm262_vm1 = vcmp.ge.s32.totalorder (!%p221_p9), %v1770_v9, 2  ;;  %vm266_vm2 = vcmp.ge.s32.totalorder (!%p221_p9), %v1770_v9, 1  ;;  %v1265_v52 = vld [vmem:[%s2062_s2 + $0x30] sm:$0xff] (!%p221_p9)  ;;  %v1264_v53 = vld [vmem:[%s2062_s2 + $0x28] sm:$0xff] (!%p221_p9)  ;;  %v1263_v54 = vld [vmem:[%s2062_s2 + $0x20] sm:$0xff] (!%p221_p9)  ;;  %vm474_vm6 = vcmp.ge.s32.totalorder (!%p221_p9), %v1770_v9, 4 }
  0x14   : > { %vm1248_vm3 = vmpackc.low (!%p221_p9), %vm266_vm2, %vm262_vm1  ;;  %v1281_v55 = vld [vmem:[%s2064_s4 + $0x28] sm:$0xff] (!%p221_p9)  ;;  %v1494_v61 = vld [vmem:[%s2061_s1 + $0x18] sm:$0xff] (!%p221_p9)   ;;  %vm686_vm8 = vcmp.ge.s32.totalorder (!%p221_p9), %v1770_v9, 8  ;;  %vm898_vm10 = vcmp.ge.s32.totalorder (!%p221_p9), %v1770_v9, 16  ;;  %s1970_s26 = sand.u32 (!%p221_p9), 1, %s1639_s22   ;;  %s1347_s15 = sshll.u32 (!%p221_p9), %s1714_s25, 8 }
  0x15   : > { %297 = vperm.xlu1 (!%p221_p9), %1487, %v279_v4   ;;  %vm1269_vm7 = vmpackc.low (!%p221_p9), %vm262_vm1, %vm474_vm6  ;;  %v1495_v62 = vld [vmem:[%s2063_s3 + $0xc] sm:$0xff] (!%p221_p9)   ;;  %s1992_s20 = scalar_lea.hbm (!%p221_p9), %s2066_s6, %s1347_s15 }
  0x16   : > { %vm1296_vm9 = vmpackc.low (!%p221_p9), %vm474_vm6, %vm686_vm8 }
  0x17   : > { %s255_s9 = scalar_select %p254_p10, %s1714_s25, 1  ;;  %vm1323_vm11 = vmpackc.low %vm686_vm8, %vm898_vm10 }
  0x19   : > { %s1245_s10 = sshll.u32 %s255_s9, 3  ;;  %287 = vperm.xlu1 %1487, %v277_v6   ;;  %s1243_s9 = sshll.u32 %s1970_s26, 3 }
  0x1a   : > { %s257_s13 = scalar_lea.vmem %s2060_s0, %s1245_s10  ;;  %s1342_s10 = sshll.u32 %s1714_s25, 7 }
  0x1b   : > { %v1749_v1 = vld [vmem:[%s257_s13] sm:$0xff]  ;;  %s246_s11 = scalar_lea.vmem [#allocation2], %s1243_s9  ;;  %s1983_s19 = scalar_lea.hbm %s2065_s5, %s1342_s10 }
  0x1c   : > { %263 = vrot.lane.b32.xlu0 %v1749_v1, %s1649_s16  ;;  %v271_v13 = vpack.c.bf16 %v1749_v1, %v1749_v1  ;;  %s1132_s13 = sshll.u32 %s246_s11, 4  ;;  %s1655_s10 = smov [#allocation2]   ;;  %s1985_s13 = int_to_ptr.vmem [resolvable:$true] %s1132_s13 }
  0x1d   : > { %405 = vperm.xlu1 %1487, %v392_v7   ;;  %s1553_s9 = scalar_lea.vmem %s1985_s13, 128 }
  0x1e   : > { %v319_v14 = vsel %vm317_vm4, %v271_v13, 0  ;;  %p1554_p11 = scmp.ne.s32.totalorder %s1985_s13, %s1553_s9 }
  0x20   : > { %267 = vrot.lane.b32.xlu0 %v1749_v1, %s1651_s29  ;;  %s1244_s29 = sshll.u32 %s1970_s26, 4  ;;  %p1555_p12 = pnand %p1554_p11, %p1731_p5 }
  0x21   : > { %s1975_s14 = scalar_lea.vmem [#allocation4], %s1244_s29  ;;  %s1114_s29 = scalar_lea.sflag [#allocation3], %s1970_s26 }
  0x22   : > { %p1556_p13 = pneg %p1555_p12 }
  0x24   : > { %282 = vperm.xlu0 %1488, %v276_v5  }
  0x8e   : > { %v264_v10 = vpop.permute.xlu0 %263 }
  0x90   : > { %v293_v17 = vpop.permute.xlu1 %292 }
  0x92   : > { %v268_v11 = vpop.permute.xlu0 %267 }
  0x93   : > { %v1249_v12 = vpack.c.bf16 %v268_v11, %v264_v10 }
  0x94   : > { %v298_v21 = vpop.permute.xlu1 %297 }
  0x95   : > { %1376 = vmatprep.subr.msk.bf16.mxu0 %vm1248_vm3, %v1249_v12 }
  0x96   : > { %1377 = vmatpush3.bf16.msk.msra.mxu0 %vm1248_vm3, %v1249_v12 }
  0x97   : > { %1432 = vmatprep.subr.msk.bf16.mxu0 %vm317_vm4, %v271_v13 }
  0x98   : > { %v288_v29 = vpop.permute.xlu1 %287 }
  0x9a   : > { %1379 = vmatpush3.bf16.msra.mxu0 %v319_v14 }
  0x9c   : > { %v406_v44 = vpop.permute.xlu1 %405 }
  0x9d   : > { %1381 = vmatmul.mubr.msk.bf16.vlgmr.msra.gmra.mrb[0].mxu0 %vm310_vm0, %v1490_v15 }
  0x9e   : > { %1400 = vmatprep.mubr.msk.bf16.mxu0 %vm416_vm5, %v1495_v62 }
  0xa3   : > { %v283_v27 = vpop.permute.xlu0 %282 }
 0x170   : > { %v1382_v18 = vpop.f32.mrb[0].mxu0 }
 0x171   : > { %v364_v19 = vadd.f32 %v1382_v18, %v293_v17  ;;  %v355_v20 = vpop.f32.mrb[1].mxu0 }
 0x172   : > { %v1383_v22 = vpop.f32.mrb[2].mxu0  ;;  %v356_v28 = vadd.f32 %v355_v20, %v283_v27 }
 0x173   : > { %v1253_v23 = vmul.f32 -1.442695, %v364_v19  ;;  %v367_v24 = vadd.f32 %v1383_v22, %v298_v21  ;;  %v358_v25 = vpop.f32.mrb[3].mxu0 }
 0x174   : > { %v359_v31 = vadd.f32 %v358_v25, %v288_v29  ;;  %v1496_v25 = vld [vmem:[%s2063_s3 + $0x14] ss:$0 sps:$4 sm:$0xff]  }
 0x175   : > { %1505 = vpow2.f32 %v1253_v23  ;;  %v1254_v26 = vmul.f32 -1.442695, %v367_v24 }
 0x177   : > { %1507 = vpow2.f32 %v1254_v26  ;;  %v1497_v26 = vld [vmem:[%s2061_s1 + $0x20] sm:$0xff]  }
 0x178   : > { %1509 = vtanh.f32 %v356_v28 }
 0x17f   : > { %v1506_v30 = vpop.eup %1505 }
 0x180   : > { %v378_v32 = vadd.f32 1.0, %v1506_v30 }
 0x181   : > { %v1508_v33 = vpop.eup %1507 }
 0x182   : > { %1511 = vrcp.f32 %v378_v32  ;;  %v379_v34 = vadd.f32 1.0, %v1508_v33  ;;  %v1510_v35 = vpop.eup %1509 }
 0x183   : > { %1513 = vtanh.f32 %v359_v31 }
 0x184   : > { %1515 = vrcp.f32 %v379_v34  ;;  %v1293_v34 = vld [vmem:[%s2062_s2 + $0x58] sm:$0xff] }
 0x18c   : > { %v1512_v36 = vpop.eup %1511 }
 0x18d   : > { %v1514_v37 = vpop.eup %1513  ;;  %v384_v38 = vmul.f32 %v1512_v36, %v1510_v35  ;;  %v1292_v35 = vld [vmem:[%s2062_s2 + $0x50] sm:$0xff]  ;;  %v1291_v36 = vld [vmem:[%s2062_s2 + $0x48] sm:$0xff] }
 0x18e   : > { %v1516_v39 = vpop.eup %1515 }
 0x18f   : > { %v385_v40 = vmul.f32 %v1516_v39, %v1514_v37  ;;  %v1290_v37 = vld [vmem:[%s2062_s2 + $0x40] sm:$0xff] }
 0x191   : > { %v389_v41 = vpack.c.bf16 %v385_v40, %v384_v38  ;;  %v1308_v38 = vld [vmem:[%s2064_s4 + $0x40] sm:$0xff] }
 0x193   : > { %1384 = vmatprep.subr.bf16.mxu1 %v389_v41 }
 0x194   : > { %1385 = vmatpush3.bf16.msra.mxu1 %v389_v41 }
 0x197   : > { %1387 = vmatmul.mubr.msk.bf16.vlgmr.msra.gmra.mrb[0].mxu1 %vm416_vm5, %v1492_v42 }
 0x198   : > { %1394 = vmatprep.mubr.msk.bf16.mxu1 %vm310_vm0, %v1493_v43 }
 0x26a   : > { %v1388_v45 = vpop.f32.mrb[0].mxu1 }
 0x26b   : > { %v466_v46 = vadd.f32 %v1388_v45, %v406_v44  ;;  %v1795_v47 = vpop.f32.mrb[1].mxu1  ;;  %v1498_v44 = vld [vmem:[%s2061_s1 + $0x28] sm:$0xff]   ;;  %v1499_v45 = vld [vmem:[%s2063_s3 + $0x18] sm:$0xff]  }
 0x26c   : > { %v1389_v48 = vpop.f32.mrb[2].mxu1 }
 0x26d   : > { %v1799_v49 = vadd.f32 %v466_v46, %v1749_v1  ;;  %v1801_v50 = vpop.f32.mrb[3].mxu1 }
 0x26f   : > { %478 = vrot.lane.b32.xlu1 %v1799_v49, %s1649_s16  ;;  %475 = vrot.lane.b32.xlu0 %v1799_v49, %s1652_s28  ;;  %v482_v59 = vpack.c.bf16 %v1799_v49, %v1799_v49  ;;  %s1145_s16 = sshll.u32 %s1975_s14, 4  ;;  %s1987_s16 = int_to_ptr.vmem [resolvable:$true] %s1145_s16 }
 0x271   : > { %v530_v60 = vsel %vm317_vm4, %v482_v59, 0 }
 0x273   : > { %510 = vperm.xlu1 %1487, %v1266_v51   ;;  %505 = vperm.xlu0 %1488, %v1265_v52  }
 0x277   : > { %500 = vperm.xlu1 %1487, %v1264_v53   ;;  %495 = vperm.xlu0 %1488, %v1263_v54  }
 0x27b   : > { %618 = vperm.xlu0 %1488, %v1281_v55  }
 0x2e1   : > { %v479_v56 = vpop.permute.xlu1 %478  ;;  %v476_v57 = vpop.permute.xlu0 %475 }
 0x2e2   : > { %v1270_v58 = vpack.c.bf16 %v479_v56, %v476_v57 }
 0x2e4   : > { %1390 = vmatprep.subr.msk.bf16.mxu1 %vm1269_vm7, %v1270_v58 }
 0x2e5   : > { %1391 = vmatpush3.bf16.msk.msra.mxu1 %vm1269_vm7, %v1270_v58 }
 0x2e6   : > { %1433 = vmatprep.subr.msk.bf16.mxu1 %vm317_vm4, %v482_v59 }
 0x2e9   : > { %1393 = vmatpush3.bf16.msra.mxu1 %v530_v60 }
 0x2ec   : > { %1395 = vmatmul.mubr.msk.bf16.vlgmr.msra.gmra.mrb[4].mxu1 %vm310_vm0, %v1494_v61 }
 0x2ed   : > { %1408 = vmatprep.mubr.msk.bf16.mxu1 %vm310_vm0, %v1497_v26  ;;  %v1279_v26 = vld [vmem:[%s2064_s4 + $0x18] sm:$0xff] }
 0x2f2   : > { %v506_v63 = vpop.permute.xlu0 %505  ;;  %v511_v3 = vpop.permute.xlu1 %510 }
 0x2f6   : > { %v496_v10 = vpop.permute.xlu0 %495  ;;  %v501_v12 = vpop.permute.xlu1 %500 }
 0x2fa   : > { %v619_v27 = vpop.permute.xlu0 %618 }
 0x3bf   : > { %v1396_v0 = vpop.f32.mrb[4].mxu1 }
 0x3c0   : > { %v575_v1 = vadd.f32 %v1396_v0, %v506_v63  ;;  %v566_v2 = vpop.f32.mrb[5].mxu1 }
 0x3c1   : > { %v1397_v4 = vpop.f32.mrb[6].mxu1  ;;  %v567_v11 = vadd.f32 %v566_v2, %v496_v10  ;;  %v1500_v10 = vld [vmem:[%s2063_s3 + $0x20] ss:$0 sps:$4 sm:$0xff]  }
 0x3c2   : > { %v1274_v5 = vmul.f32 -1.442695, %v575_v1  ;;  %v578_v6 = vadd.f32 %v1397_v4, %v511_v3  ;;  %v569_v7 = vpop.f32.mrb[7].mxu1 }
 0x3c3   : > { %v570_v14 = vadd.f32 %v569_v7, %v501_v12 }
 0x3c4   : > { %1517 = vpow2.f32 %v1274_v5  ;;  %v1275_v8 = vmul.f32 -1.442695, %v578_v6 }
 0x3c6   : > { %1519 = vpow2.f32 %v1275_v8 }
 0x3c7   : > { %1521 = vtanh.f32 %v567_v11  ;;  %v1501_v11 = vld [vmem:[%s2061_s1 + $0x30] sm:$0xff]  }
 0x3ce   : > { %v1518_v13 = vpop.eup %1517 }
 0x3cf   : > { %v589_v15 = vadd.f32 1.0, %v1518_v13 }
 0x3d0   : > { %v1520_v16 = vpop.eup %1519 }
 0x3d1   : > { %1523 = vrcp.f32 %v589_v15  ;;  %v590_v17 = vadd.f32 1.0, %v1520_v16  ;;  %v1522_v18 = vpop.eup %1521 }
 0x3d2   : > { %1525 = vtanh.f32 %v570_v14 }
 0x3d3   : > { %1527 = vrcp.f32 %v590_v17 }
 0x3db   : > { %v1524_v19 = vpop.eup %1523 }
 0x3dc   : > { %v1526_v20 = vpop.eup %1525  ;;  %v595_v21 = vmul.f32 %v1524_v19, %v1522_v18  ;;  %v1320_v19 = vld [vmem:[%s2062_s2 + $0x78] sm:$0xff] }
 0x3dd   : > { %v1528_v22 = vpop.eup %1527 }
 0x3de   : > { %v596_v23 = vmul.f32 %v1528_v22, %v1526_v20  ;;  %v1319_v20 = vld [vmem:[%s2062_s2 + $0x70] sm:$0xff]  ;;  %v1317_v22 = vld [vmem:[%s2062_s2 + $0x60] sm:$0xff] }
 0x3e0   : > { %v601_v24 = vpack.c.bf16 %v596_v23, %v595_v21  ;;  %v1318_v21 = vld [vmem:[%s2062_s2 + $0x68] sm:$0xff] }
 0x3e1   : > { %v391_v23 = vld [vmem:[%s2064_s4 + $0x8] sm:$0xff] }
 0x3e2   : > { %1398 = vmatprep.subr.bf16.mxu0 %v601_v24 }
 0x3e3   : > { %1399 = vmatpush3.bf16.msra.mxu0 %v601_v24  ;;  %v390_v24 = vld [vmem:[%s2064_s4] sm:$0xff] }
 0x3e6   : > { %1401 = vmatmul.mubr.msk.bf16.vlgmr.msra.gmra.mrb[4].mxu0 %vm416_vm5, %v1496_v25  ;;  %v1280_v25 = vld [vmem:[%s2064_s4 + $0x20] sm:$0xff] }
 0x3e7   : > { %1414 = vmatprep.mubr.msk.bf16.mxu0 %vm416_vm5, %v1499_v45 }
 0x4b9   : > { %v1402_v28 = vpop.f32.mrb[4].mxu0 }
 0x4ba   : > { %v678_v29 = vadd.f32 %v1402_v28, %v619_v27  ;;  %v1846_v30 = vpop.f32.mrb[5].mxu0  ;;  %v1307_v27 = vld [vmem:[%s2064_s4 + $0x38] sm:$0xff]  ;;  %v1306_v28 = vld [vmem:[%s2064_s4 + $0x30] sm:$0xff] }
 0x4bb   : > { %v1403_v31 = vpop.f32.mrb[6].mxu0 }
 0x4bc   : > { %v1850_v32 = vadd.f32 %v678_v29, %v1799_v49  ;;  %v1852_v33 = vpop.f32.mrb[7].mxu0  ;;  %v1334_v29 = vld [vmem:[%s2064_s4 + $0x50] sm:$0xff]  ;;  %v1333_v31 = vld [vmem:[%s2064_s4 + $0x48] sm:$0xff] }
 0x4be   : > { %690 = vrot.lane.b32.xlu0 %v1850_v32, %s1652_s28  ;;  %687 = vrot.lane.b32.xlu1 %v1850_v32, %s1653_s12  ;;  %v694_v42 = vpack.c.bf16 %v1850_v32, %v1850_v32 }
 0x4c0   : > { %v742_v43 = vsel %vm317_vm4, %v694_v42, 0 }
 0x4c2   : > { %722 = vperm.xlu0 %1488, %v1293_v34   ;;  %717 = vperm.xlu1 %1487, %v1292_v35  }
 0x4c6   : > { %712 = vperm.xlu0 %1488, %v1291_v36   ;;  %707 = vperm.xlu1 %1487, %v1290_v37  }
 0x4ca   : > { %830 = vperm.xlu1 %1487, %v1308_v38  }
 0x530   : > { %v691_v39 = vpop.permute.xlu0 %690  ;;  %v688_v40 = vpop.permute.xlu1 %687 }
 0x531   : > { %v1297_v41 = vpack.c.bf16 %v691_v39, %v688_v40  ;;  %v1502_v39 = vld [vmem:[%s2061_s1 + $0x38] sm:$0xff]  }
 0x533   : > { %1404 = vmatprep.subr.msk.bf16.mxu1 %vm1296_vm9, %v1297_v41 }
 0x534   : > { %1405 = vmatpush3.bf16.msk.msra.mxu1 %vm1296_vm9, %v1297_v41 }
 0x535   : > { %1434 = vmatprep.subr.msk.bf16.mxu1 %vm317_vm4, %v694_v42 }
 0x538   : > { %1407 = vmatpush3.bf16.msra.mxu1 %v742_v43 }
 0x53b   : > { %1409 = vmatmul.mubr.msk.bf16.vlgmr.msra.gmra.mrb[8].mxu1 %vm310_vm0, %v1498_v44 }
 0x53c   : > { %1422 = vmatprep.mubr.msk.bf16.mxu1 %vm310_vm0, %v1501_v11 }
 0x541   : > { %v718_v46 = vpop.permute.xlu1 %717  ;;  %v723_v52 = vpop.permute.xlu0 %722 }
 0x545   : > { %v708_v58 = vpop.permute.xlu1 %707  ;;  %v713_v60 = vpop.permute.xlu0 %712 }
 0x549   : > { %v831_v12 = vpop.permute.xlu1 %830 }
 0x60e   : > { %v1410_v48 = vpop.f32.mrb[8].mxu1 }
 0x60f   : > { %v787_v49 = vadd.f32 %v1410_v48, %v718_v46  ;;  %v778_v51 = vpop.f32.mrb[9].mxu1 }
 0x610   : > { %v1411_v53 = vpop.f32.mrb[10].mxu1  ;;  %v779_v59 = vadd.f32 %v778_v51, %v708_v58 }
 0x611   : > { %v1301_v54 = vmul.f32 -1.442695, %v787_v49  ;;  %v790_v55 = vadd.f32 %v1411_v53, %v723_v52  ;;  %v781_v56 = vpop.f32.mrb[11].mxu1 }
 0x612   : > { %v782_v62 = vadd.f32 %v781_v56, %v713_v60 }
 0x613   : > { %1529 = vpow2.f32 %v1301_v54  ;;  %v1302_v57 = vmul.f32 -1.442695, %v790_v55 }
 0x615   : > { %1531 = vpow2.f32 %v1302_v57 }
 0x616   : > { %1533 = vtanh.f32 %v779_v59 }
 0x61d   : > { %v1530_v61 = vpop.eup %1529 }
 0x61e   : > { %v801_v63 = vadd.f32 1.0, %v1530_v61  ;;  %v1503_v61 = vld [vmem:[%s2063_s3 + $0x24] sm:$0xff]  }
 0x61f   : > { %v1532_v0 = vpop.eup %1531 }
 0x620   : > { %1535 = vrcp.f32 %v801_v63  ;;  %v802_v1 = vadd.f32 1.0, %v1532_v0  ;;  %v1534_v2 = vpop.eup %1533 }
 0x621   : > { %1537 = vtanh.f32 %v782_v62 }
 0x622   : > { %1539 = vrcp.f32 %v802_v1 }
 0x62a   : > { %v1536_v3 = vpop.eup %1535 }
 0x62b   : > { %v1538_v4 = vpop.eup %1537  ;;  %v807_v5 = vmul.f32 %v1536_v3, %v1534_v2 }
 0x62c   : > { %v1540_v6 = vpop.eup %1539 }
 0x62d   : > { %v808_v7 = vmul.f32 %v1540_v6, %v1538_v4 }
 0x62f   : > { %v813_v8 = vpack.c.bf16 %v808_v7, %v807_v5 }
 0x631   : > { %1412 = vmatprep.subr.bf16.mxu0 %v813_v8 }
 0x632   : > { %1413 = vmatpush3.bf16.msra.mxu0 %v813_v8 }
 0x635   : > { %1415 = vmatmul.mubr.msk.bf16.vlgmr.msra.gmra.mrb[8].mxu0 %vm416_vm5, %v1500_v10 }
 0x636   : > { %1428 = vmatprep.mubr.msk.bf16.mxu0 %vm416_vm5, %v1503_v61 }
 0x708   : > { %v1416_v13 = vpop.f32.mrb[8].mxu0 }
 0x709   : > { %v890_v14 = vadd.f32 %v1416_v13, %v831_v12  ;;  %v1897_v15 = vpop.f32.mrb[9].mxu0 }
 0x70a   : > { %v1417_v16 = vpop.f32.mrb[10].mxu0 }
 0x70b   : > { %v1901_v17 = vadd.f32 %v890_v14, %v1850_v32  ;;  %v884_v18 = vpop.f32.mrb[11].mxu0  ;;  %v1335_v32 = vld [vmem:[%s2064_s4 + $0x58] sm:$0xff]  ;;  %v1504_v16 = vld [vmem:[%s2063_s3 + $0x2c] ss:$0 sps:$4 sm:$0xff]  }
 0x70d   : > { %902 = vrot.lane.b32.xlu1 %v1901_v17, %s1653_s12  ;;  %899 = vrot.lane.b32.xlu0 %v1901_v17, %s1654_s17  ;;  %v906_v37 = vpack.c.bf16 %v1901_v17, %v1901_v17  ;;  %s1557_s17 = sshll.u32 %s1655_s10, 4  ;;  %s1558_s17 = int_to_ptr.vmem [resolvable:$false] %s1557_s17 }
 0x70e   : > { %s1559_s18 = scalar_lea.vmem %s1558_s17, 256  ;;  %p1560_p0 = scmp.lt.s32.totalorder %s1985_s13, %s1558_s17 }
 0x70f   : > { %v954_v38 = vsel %vm317_vm4, %v906_v37, 0  ;;  %p1561_p1 = scmp.lt.s32.totalorder %s1559_s18, %s1553_s9 }
 0x711   : > { %934 = vperm.xlu1 %1487, %v1320_v19   ;;  %929 = vperm.xlu0 %1488, %v1319_v20   ;;  %p1562_p2 = por %p1561_p1, %p1560_p0 }
 0x713   : > { %p1563_p3 = pnand %p1562_p2, %p1556_p13 }
 0x715   : > { %924 = vperm.xlu1 %1487, %v1318_v21   ;;  %919 = vperm.xlu0 %1488, %v1317_v22  }
 0x719   : > { %400 = vperm.xlu1 %1487, %v391_v23   ;;  %395 = vperm.xlu0 %1488, %v390_v24  }
 0x71d   : > { %613 = vperm.xlu1 %1487, %v1280_v25   ;;  %608 = vperm.xlu0 %1488, %v1279_v26  }
 0x721   : > { %825 = vperm.xlu1 %1487, %v1307_v27   ;;  %820 = vperm.xlu0 %1488, %v1306_v28  }
 0x725   : > { %1037 = vperm.xlu1 %1487, %v1334_v29   ;;  %1032 = vperm.xlu0 %1488, %v1333_v31  }
 0x729   : > { %1042 = vperm.xlu0 %1488, %v1335_v32  }
 0x77f   : > { %v903_v34 = vpop.permute.xlu1 %902  ;;  %v900_v35 = vpop.permute.xlu0 %899 }
 0x780   : > { %v1324_v36 = vpack.c.bf16 %v903_v34, %v900_v35 }
 0x782   : > { %1418 = vmatprep.subr.msk.bf16.mxu1 %vm1323_vm11, %v1324_v36 }
 0x783   : > { %1419 = vmatpush3.bf16.msk.msra.mxu1 %vm1323_vm11, %v1324_v36 }
 0x784   : > { %1435 = vmatprep.subr.msk.bf16.mxu1 %vm317_vm4, %v906_v37 }
 0x787   : > { %1421 = vmatpush3.bf16.msra.mxu1 %v954_v38 }
 0x78a   : > { %1423 = vmatmul.mubr.msk.bf16.vlgmr.msra.gmra.mrb[12].mxu1 %vm310_vm0, %v1502_v39 }
 0x790   : > { %v935_v40 = vpop.permute.xlu1 %934  ;;  %v930_v9 = vpop.permute.xlu0 %929 }
 0x794   : > { %v925_v41 = vpop.permute.xlu1 %924  ;;  %v920_v42 = vpop.permute.xlu0 %919 }
 0x798   : > { %v401_v43 = vpop.permute.xlu1 %400  ;;  %v396_v44 = vpop.permute.xlu0 %395 }
 0x799   : > { %v461_v48 = vadd.f32 %v1801_v50, %v401_v43  ;;  %v458_v49 = vadd.f32 %v1795_v47, %v396_v44 }
 0x79c   : > { %v614_v45 = vpop.permute.xlu1 %613  ;;  %v609_v46 = vpop.permute.xlu0 %608 }
 0x79d   : > { %v673_v51 = vadd.f32 %v1852_v33, %v614_v45  ;;  %v670_v52 = vadd.f32 %v1846_v30, %v609_v46 }
 0x79f   : > { %v684_v53 = vadd.f32 %v673_v51, %v461_v48  ;;  %v683_v54 = vadd.f32 %v670_v52, %v458_v49 }
 0x7a0   : > { %v826_v55 = vpop.permute.xlu1 %825  ;;  %v821_v56 = vpop.permute.xlu0 %820 }
 0x7a1   : > { %v885_v57 = vadd.f32 %v884_v18, %v826_v55  ;;  %v882_v58 = vadd.f32 %v1897_v15, %v821_v56 }
 0x7a3   : > { %v896_v59 = vadd.f32 %v885_v57, %v684_v53  ;;  %v895_v60 = vadd.f32 %v882_v58, %v683_v54 }
 0x7a4   : > { %v1033_v18 = vpop.permute.xlu0 %1032  ;;  %v1038_v25 = vpop.permute.xlu1 %1037 }
 0x7a8   : > { %v1043_v19 = vpop.permute.xlu0 %1042 }
 0x85d   : > { %v1424_v47 = vpop.f32.mrb[12].mxu1 }
 0x85e   : > { %v999_v50 = vadd.f32 %v1424_v47, %v930_v9  ;;  %v990_v33 = vpop.f32.mrb[13].mxu1 }
 0x85f   : > { %v1425_v62 = vpop.f32.mrb[14].mxu1  ;;  %v991_v2 = vadd.f32 %v990_v33, %v920_v42 }
 0x860   : > { %v1328_v30 = vmul.f32 -1.442695, %v999_v50  ;;  %v1002_v63 = vadd.f32 %v1425_v62, %v935_v40  ;;  %v993_v0 = vpop.f32.mrb[15].mxu1 }
 0x861   : > { %v994_v4 = vadd.f32 %v993_v0, %v925_v41 }
 0x862   : > { %1541 = vpow2.f32 %v1328_v30  ;;  %v1329_v1 = vmul.f32 -1.442695, %v1002_v63 }
 0x864   : > { %1543 = vpow2.f32 %v1329_v1 }
 0x865   : > { %1545 = vtanh.f32 %v991_v2 }
 0x86c   : > { %v1542_v3 = vpop.eup %1541 }
 0x86d   : > { %v1013_v5 = vadd.f32 1.0, %v1542_v3 }
 0x86e   : > { %v1544_v6 = vpop.eup %1543 }
 0x86f   : > { %1547 = vrcp.f32 %v1013_v5  ;;  %v1014_v7 = vadd.f32 1.0, %v1544_v6  ;;  %v1546_v8 = vpop.eup %1545 }
 0x870   : > { %1549 = vtanh.f32 %v994_v4 }
 0x871   : > { %1551 = vrcp.f32 %v1014_v7 }
 0x879   : > { %v1548_v10 = vpop.eup %1547 }
 0x87a   : > { %v1550_v11 = vpop.eup %1549  ;;  %v1019_v12 = vmul.f32 %v1548_v10, %v1546_v8 }
 0x87b   : > { %v1552_v13 = vpop.eup %1551 }
 0x87c   : > { %v1020_v14 = vmul.f32 %v1552_v13, %v1550_v11 }
 0x87e   : > { %v1025_v15 = vpack.c.bf16 %v1020_v14, %v1019_v12 }
 0x880   : > { %1426 = vmatprep.subr.bf16.mxu0 %v1025_v15 }
 0x881   : > { %1427 = vmatpush3.bf16.msra.mxu0 %v1025_v15 }
 0x884   : > { %1429 = vmatmul.mubr.msk.bf16.vlgmr.msra.gmra.mrb[12].mxu0 %vm416_vm5, %v1504_v16 }
 0x957   : > { %v1430_v20 = vpop.f32.mrb[12].mxu0 }
 0x958   : > { %v1102_v21 = vadd.f32 %v1430_v20, %v1043_v19  ;;  %v1093_v22 = vpop.f32.mrb[13].mxu0 }
 0x959   : > { %v1094_v23 = vadd.f32 %v1093_v22, %v1033_v18  ;;  %v1431_v24 = vpop.f32.mrb[14].mxu0 }
 0x95a   : > { %v1109_v26 = vadd.f32 %v1102_v21, %v1901_v17  ;;  %v1096_v27 = vpop.f32.mrb[15].mxu0 }
 0x95b   : > { %v1107_v28 = vadd.f32 %v1094_v23, %v895_v60  ;;  %v1097_v29 = vadd.f32 %v1096_v27, %v1038_v25 }
 0x95c   : > { %1110 = vst [vmem:[%s246_s11] sm:$0xff] %v1109_v26 }
 0x95d   : > { %1111 = vst [vmem:[%s1975_s14] sm:$0xff] %v1107_v28  ;;  %v1108_v17 = vadd.f32 %v1097_v29, %v896_v59 }
 0x95e   : > { %1566 = shalt.err (!%p1563_p3)
}
 0x95f   : > { %s1567_s11 = scalar_lea.hbm %s1983_s19, 128  ;;  %s1571_s28 = scalar_lea.hbm %s2065_s5, 256 }
 0x960   : > { %p1568_p4 = scmp.ne.s32.totalorder %s1983_s19, %s1567_s11  ;;  %p1572_p9 = scmp.lt.u32.totalorder %s1983_s19, %s2065_s5 }
 0x961   : > { %p1573_p10 = scmp.lt.u32.totalorder %s1571_s28, %s1567_s11  ;;  %p1575_p12 = scmp.lt.u32.totalorder %s1567_s11, %s1983_s19 }
 0x962   : > { %p1569_p7 = pnand %p1568_p4, %p1731_p5 }
 0x963   : > { %p1574_p11 = por %p1573_p10, %p1572_p9 }
 0x964   : > { %p1570_p8 = pneg %p1569_p7 }
 0x965   : > { %p1576_p13 = por %p1575_p12, %p1574_p11 }
 0x967   : > { %p1577_p0 = pnand %p1576_p13, %p1570_p8 }
 0x969   : > { %1580 = shalt.err (!%p1577_p0)
}
 0x96a   : > { %1436 = dma.vmem_to_hbm [thread:$0]  (%p1731_p5), %s1985_s13, 128, %s1983_s19, %s1114_s29   ;;  %1112 = vst [vmem:[%s1975_s14 + $0x8] sm:$0xff] %v1108_v17 }
 0x96b   : > { %s1119_s9 = scalar_lea.sflag [#allocation5], %s1970_s26  ;;  %s1581_s18 = scalar_lea.vmem %s1987_s16, 256 }
 0x96c   : > { %p1582_p1 = scmp.ne.s32.totalorder %s1987_s16, %s1581_s18  ;;  %s1656_s11 = smov [#allocation4]  }
 0x96d   : > { %s1585_s15 = sshll.u32 %s1656_s11, 4  ;;  %s1586_s15 = int_to_ptr.vmem [resolvable:$false] %s1585_s15 }
 0x96e   : > { %p1583_p2 = pnand %p1582_p1, %p1731_p5  ;;  %s1587_s25 = scalar_lea.vmem %s1586_s15, 512 }
 0x96f   : > { %p1588_p4 = scmp.lt.s32.totalorder %s1987_s16, %s1586_s15  ;;  %p1589_p7 = scmp.lt.s32.totalorder %s1587_s25, %s1581_s18 }
 0x970   : > { %p1584_p3 = pneg %p1583_p2 }
 0x971   : > { %p1590_p8 = por %p1589_p7, %p1588_p4 }
 0x973   : > { %p1591_p9 = pnand %p1590_p8, %p1584_p3 }
 0x975   : > { %1594 = shalt.err (!%p1591_p9)
}
 0x976   : > { %s1595_s13 = scalar_lea.hbm %s1992_s20, 256  ;;  %s1599_s29 = scalar_lea.hbm %s2066_s6, 512 }
 0x977   : > { %p1596_p10 = scmp.ne.s32.totalorder %s1992_s20, %s1595_s13  ;;  %p1600_p13 = scmp.lt.u32.totalorder %s1992_s20, %s2066_s6 }
 0x978   : > { %p1601_p0 = scmp.lt.u32.totalorder %s1599_s29, %s1595_s13  ;;  %p1603_p2 = scmp.lt.u32.totalorder %s1595_s13, %s1992_s20 }
 0x979   : > { %p1597_p11 = pnand %p1596_p10, %p1731_p5 }
 0x97a   : > { %p1602_p1 = por %p1601_p0, %p1600_p13 }
 0x97b   : > { %p1598_p12 = pneg %p1597_p11 }
 0x97c   : > { %p1604_p3 = por %p1603_p2, %p1602_p1 }
 0x97e   : > { %p1605_p4 = pnand %p1604_p3, %p1598_p12 }
 0x980   : > { %1608 = shalt.err (!%p1605_p4)
}
 0x981   : > { %s1657_s17 = smov 128  }
 0x982   : > { %1437 = dma.vmem_to_hbm [thread:$0]  (%p1731_p5), %s1987_s16, 256, %s1992_s20, %s1119_s9, %s1657_s17, %s1657_s17, %s1653_s12  }
 0x983 PF: > { %p1447_p7 = scmp.ge.s32.totalorder %s1647_s24, 2  ;;  %s1160_s18 = sand.u32 1, %s1635_s21  }
 0x984   : > { %s1161_s11 = scalar_lea.sflag [#allocation3], %s1160_s18 }
 0x985   : > { %p1441_p8 = pnand %p1447_p7, %p1735_p6 }
 0x987   : > { %1626 = dma.done.wait (!%p1441_p8), %s1161_s11, 128  }
 0x988   : > { %1628 = vsyncadd (!%p1441_p8), %s1161_s11, 4294967168  ;;  %s1170_s15 = scalar_lea.sflag [#allocation5], %s1160_s18 }
 0x989   : > { %1630 = dma.done.wait (!%p1441_p8), %s1170_s15, 256  }
 0x98a   : > { %1632 = vsyncadd (!%p1441_p8), %s1170_s15, 4294967040  ;;  %p20_p5 = scmp.ge.s32.totalorder %s1718_s27, 4   ;;  %s2069_s21 = smov %s1639_s22 }
 0x98b   : > { %s2070_s22 = smov %s1643_s23  ;;  %s2071_s23 = smov %s1729_s30 }
 0x98c   : > { %s2072_s24 = smov %s1718_s27  ;;  %22 = sbr.rel (!%p20_p5) target bundleno = 5 (0x5), region = 104 }
 0x993   :  { %1175 = vsyncpa [#allocation3], 1 }
 0x994   :  { %1177 = vsyncpa [#allocation3 + $0x1], 1 }
 0x995   :  { %1178 = vsyncpa [#allocation5], 1 }
 0x996   :  { %1180 = vsyncpa [#allocation5 + $0x1], 1 }

</bundles_post_ra>
